<compile_context>
chip_gen: v7x
topology: tpu7x:2x2x1
jax: 0.10.0
libtpu: 0.0.40
codegen_flags: <defaults>
</compile_context>

<pallas_src>
import jax
import jax.numpy as jnp
from jax.experimental import pallas as pl
from jax.experimental.pallas import tpu as pltpu


def _round_up(x: int, m: int) -> int:
    return (x + m - 1) // m * m


_D_TILE_BYTES = 4 * 1024 * 1024    # target (padded) bytes per d_scn buffer
_SEL_BYTES_MAX = 2 * 1024 * 1024   # cap on the block-diagonal selection matrix


def _choose_tb(B: int, bytes_per_row: int) -> int:
    """Batch-tile size, derived from the padded footprint of the d stream."""
    tb = max(8, (_D_TILE_BYTES // max(bytes_per_row, 1)) // 8 * 8)
    if B >= 16:
        # Keep >= 2 grid steps so the parallel batch axis can be split across
        # TensorCores on megacore parts (v7x).
        tb = min(tb, _round_up(pl.cdiv(B, 2), 8))
    if tb >= B:
        tb = B  # single full block (block dim == full array dim is always legal)
    return tb


def _tile_lanes(x, reps: int):
    """Repeat x `reps` times along the lane axis using O(log reps) concats."""
    total = x.shape[-1] * reps
    y = x
    while y.shape[-1] < total:
        y = jnp.concatenate([y, y], axis=-1)
    return y[:, :total]


# ---------- lane-dense path (C < 128): VPU multiply + MXU segmented reduce ----------

def _mirt_lane_dense_kernel(d_ref, p_ref, beta_ref, sel_ref, out_ref):
    # d_ref: (tb, I*C)  p_ref: (tb, C)  beta_ref: (tb, I)  sel_ref: (I*C, I)
    num_items = out_ref.shape[-1]
    d = d_ref[...].astype(jnp.float32)
    p = p_ref[...].astype(jnp.float32)                       # cast-after-load (v5e-safe)
    dp = d * _tile_lanes(p, num_items)                        # (tb, I*C), lane-dense
    logits = jnp.dot(dp, sel_ref[...],
                     preferred_element_type=jnp.float32)      # (tb, I) on the idle MXU
    out_ref[...] = jax.nn.sigmoid(
        logits + beta_ref[...].astype(jnp.float32)).astype(out_ref.dtype)


# ---------- generic 3-D path (C >= 128 or very large I*C): VPU reduction ------------

def _mirt_block_kernel(d_ref, p_ref, beta_ref, out_ref):
    # d_ref: (tb, ti, C)  p_ref: (tb, C)  beta_ref: (tb, ti)
    d = d_ref[...].astype(jnp.float32)
    p = p_ref[...].astype(jnp.float32)
    logits = jnp.sum(d * p[:, None, :], axis=-1)              # (tb, ti), stays 2-D
    out_ref[...] = jax.nn.sigmoid(
        logits + beta_ref[...].astype(jnp.float32)).astype(out_ref.dtype)


def mirt_forward(p_lrn: jax.Array, d_scn: jax.Array, beta_scn: jax.Array) -> jax.Array:
    """sigmoid(einsum('bic,bc->bi', d_scn, p_lrn) + beta_scn) via Pallas."""
    B, I, C = d_scn.shape
    assert p_lrn.shape == (B, C)
    assert beta_scn.shape == (B, I)

    out_dtype = jnp.result_type(d_scn.dtype, p_lrn.dtype, beta_scn.dtype)
    d_itemsize = jnp.dtype(d_scn.dtype).itemsize

    use_lane_dense = (
        C < 128
        and I * I * C * 4 <= _SEL_BYTES_MAX                      # sel matrix small
        and _round_up(I * C, 128) * d_itemsize <= _D_TILE_BYTES  # one row fits budget
    )

    if use_lane_dense:
        d_flat = d_scn.reshape(B, I * C)      # free: contiguous row-major reshape
        bytes_per_row = _round_up(I * C, 128) * d_itemsize
        tb = _choose_tb(B, bytes_per_row)
        grid = (pl.cdiv(B, tb),)

        # Static 0/1 block-diagonal selection matrix: sel[j, i] = (j // C == i).
        row = jax.lax.broadcasted_iota(jnp.int32, (I * C, I), 0)
        col = jax.lax.broadcasted_iota(jnp.int32, (I * C, I), 1)
        sel = (row // C == col).astype(jnp.float32)

        return pl.pallas_call(
            _mirt_lane_dense_kernel,
            out_shape=jax.ShapeDtypeStruct((B, I), out_dtype),
            grid_spec=pltpu.PrefetchScalarGridSpec(
                num_scalar_prefetch=0,
                grid=grid,
                in_specs=[
                    pl.BlockSpec((tb, I * C), lambda b: (b, 0)),   # d (dominant stream)
                    pl.BlockSpec((tb, C), lambda b: (b, 0)),       # p
                    pl.BlockSpec((tb, I), lambda b: (b, 0)),       # beta
                    pl.BlockSpec((I * C, I), lambda b: (0, 0)),    # sel (resident)
                ],
                out_specs=pl.BlockSpec((tb, I), lambda b: (b, 0)),
            ),
            compiler_params=pltpu.CompilerParams(
                dimension_semantics=("parallel",),
            ),
        )(d_flat, p_lrn, beta_scn, sel)

    # ---- generic fallback: (batch, item) grid, VPU reduction over C ----
    c_pad = _round_up(C, 128)
    if _round_up(I, 8) * c_pad * d_itemsize <= _D_TILE_BYTES:
        ti = I
    else:
        # I-tiling: item-tile must be a multiple of 128 (beta/out lane dim).
        ti = max(128, (_D_TILE_BYTES // (8 * c_pad * d_itemsize)) // 128 * 128)
        ti = min(ti, _round_up(I, 128))
    bytes_per_row = _round_up(ti, 8) * c_pad * d_itemsize
    tb = _choose_tb(B, bytes_per_row)
    grid = (pl.cdiv(B, tb), pl.cdiv(I, ti))

    return pl.pallas_call(
        _mirt_block_kernel,
        out_shape=jax.ShapeDtypeStruct((B, I), out_dtype),
        grid_spec=pltpu.PrefetchScalarGridSpec(
            num_scalar_prefetch=0,
            grid=grid,
            in_specs=[
                pl.BlockSpec((tb, ti, C), lambda b, i: (b, i, 0)),   # d
                pl.BlockSpec((tb, C), lambda b, i: (b, 0)),          # p
                pl.BlockSpec((tb, ti), lambda b, i: (b, i)),         # beta
            ],
            out_specs=pl.BlockSpec((tb, ti), lambda b, i: (b, i)),
        ),
        compiler_params=pltpu.CompilerParams(
            dimension_semantics=("parallel", "parallel"),
        ),
    )(d_scn, p_lrn, beta_scn)


if __name__ == "__main__":
    # MIRT has no learnable parameters; the inputs are the only tensors.
    key = jax.random.PRNGKey(0)

    # --- primary check: lane-dense path (C < 128) ---
    B, I, C = 2, 16, 32  # batch, num items, num concepts
    k1, k2, k3, k4, k5, k6 = jax.random.split(key, 6)
    p_lrn = jax.random.normal(k1, (B, C), dtype=jnp.float32)
    d_scn = jax.random.normal(k2, (B, I, C), dtype=jnp.float32)
    beta_scn = jax.random.normal(k3, (B, I), dtype=jnp.float32)

    out = jax.block_until_ready(mirt_forward(p_lrn, d_scn, beta_scn))
    ref = jax.nn.sigmoid(jnp.sum(d_scn * p_lrn[:, None, :], axis=-1) + beta_scn)
    assert out.shape == (B, I)
    assert jnp.allclose(out, ref, atol=1e-4, rtol=1e-4), "lane-dense path mismatch"

    # --- secondary check: generic 3-D fallback path (C >= 128) ---
    B2, I2, C2 = 4, 8, 128
    p2 = jax.random.normal(k4, (B2, C2), dtype=jnp.float32)
    d2 = jax.random.normal(k5, (B2, I2, C2), dtype=jnp.float32)
    b2 = jax.random.normal(k6, (B2, I2), dtype=jnp.float32)

    out2 = jax.block_until_ready(mirt_forward(p2, d2, b2))
    ref2 = jax.nn.sigmoid(jnp.sum(d2 * p2[:, None, :], axis=-1) + b2)
    assert out2.shape == (B2, I2)
    assert jnp.allclose(out2, ref2, atol=1e-4, rtol=1e-4), "fallback path mismatch"

    print("KERNEL_OK")
</pallas_src>

<mosaic_0001>
module attributes {stable_mosaic.version = 11 : i64} {
  func.func @_mirt_lane_dense_kernel(%arg0: i32, %arg1: memref<2x512xf32, #tpu.memory_space<vmem>>, %arg2: memref<2x32xf32, #tpu.memory_space<vmem>>, %arg3: memref<2x16xf32, #tpu.memory_space<vmem>>, %arg4: memref<512x16xf32, #tpu.memory_space<vmem>>, %arg5: memref<2x16xf32, #tpu.memory_space<vmem>>) attributes {dimension_semantics = [#tpu.dimension_semantics<parallel>], iteration_bounds = array<i64: 1>, scalar_prefetch = 0 : i64, scratch_operands = 0 : i64, tpu.core_type = #tpu.core_type<tc>, window_params = [{transform_indices = @transform_0, window_bounds = array<i64: 2, 512>}, {transform_indices = @transform_1, window_bounds = array<i64: 2, 32>}, {transform_indices = @transform_2, window_bounds = array<i64: 2, 16>}, {pipeline_mode = #tpu.pipeline_mode<synchronous>, transform_indices = @transform_3, window_bounds = array<i64: 512, 16>}, {transform_indices = @transform_4, window_bounds = array<i64: 2, 16>}]} {
    %c0 = arith.constant 0 : index
    %c0_0 = arith.constant 0 : index
    %0 = vector.load %arg1[%c0, %c0_0] : memref<2x512xf32, #tpu.memory_space<vmem>>, vector<2x512xf32>
    %c0_1 = arith.constant 0 : index
    %c0_2 = arith.constant 0 : index
    %1 = vector.load %arg2[%c0_1, %c0_2] : memref<2x32xf32, #tpu.memory_space<vmem>>, vector<2x32xf32>
    %2 = tpu.concatenate %1, %1 in 1 : vector<2x32xf32>, vector<2x32xf32> -> vector<2x64xf32>
    %3 = tpu.concatenate %2, %2 in 1 : vector<2x64xf32>, vector<2x64xf32> -> vector<2x128xf32>
    %4 = tpu.concatenate %3, %3 in 1 : vector<2x128xf32>, vector<2x128xf32> -> vector<2x256xf32>
    %5 = tpu.concatenate %4, %4 in 1 : vector<2x256xf32>, vector<2x256xf32> -> vector<2x512xf32>
    %6 = arith.mulf %0, %5 : vector<2x512xf32>
    %c0_3 = arith.constant 0 : index
    %c0_4 = arith.constant 0 : index
    %7 = vector.load %arg4[%c0_3, %c0_4] : memref<512x16xf32, #tpu.memory_space<vmem>>, vector<512x16xf32>
    %cst = arith.constant dense<0.000000e+00> : vector<2x16xf32>
    %8 = tpu.matmul %6, %7, %cst {dimension_numbers = #tpu.dot_dimension_numbers<[1], [0], [0], [1], [0, 0, 1, 1], [], []>} : vector<2x512xf32>, vector<512x16xf32>, vector<2x16xf32> -> vector<2x16xf32>
    %c0_5 = arith.constant 0 : index
    %c0_6 = arith.constant 0 : index
    %9 = vector.load %arg3[%c0_5, %c0_6] : memref<2x16xf32, #tpu.memory_space<vmem>>, vector<2x16xf32>
    %10 = arith.addf %8, %9 : vector<2x16xf32>
    %11 = arith.negf %10 : vector<2x16xf32>
    %12 = math.exp %11 : vector<2x16xf32>
    %cst_7 = arith.constant 1.000000e+00 : f32
    %13 = vector.broadcast %cst_7 : f32 to vector<2x16xf32>
    %14 = arith.addf %13, %12 : vector<2x16xf32>
    %15 = arith.divf %13, %14 : vector<2x16xf32>
    %c0_8 = arith.constant 0 : index
    %c0_9 = arith.constant 0 : index
    %16 = vector.load %arg5[%c0_8, %c0_9] : memref<2x16xf32, #tpu.memory_space<vmem>>, vector<2x16xf32>
    tpu.vector_store %arg5[%c0_8, %c0_9], %15 {strides = array<i32>} : memref<2x16xf32, #tpu.memory_space<vmem>>, vector<2x16xf32>,
    return
  }
  func.func @transform_0(%arg0: i32) -> (i32, i32) {
    %c0_i32 = arith.constant 0 : i32
    %c0_i32_0 = arith.constant 0 : i32
    return %arg0, %c0_i32 : i32, i32
  }
  func.func @transform_1(%arg0: i32) -> (i32, i32) {
    %c0_i32 = arith.constant 0 : i32
    %c0_i32_0 = arith.constant 0 : i32
    return %arg0, %c0_i32 : i32, i32
  }
  func.func @transform_2(%arg0: i32) -> (i32, i32) {
    %c0_i32 = arith.constant 0 : i32
    %c0_i32_0 = arith.constant 0 : i32
    return %arg0, %c0_i32 : i32, i32
  }
  func.func @transform_3(%arg0: i32) -> (i32, i32) {
    %c0_i32 = arith.constant 0 : i32
    %c0_i32_0 = arith.constant 0 : i32
    %c0_i32_1 = arith.constant 0 : i32
    return %c0_i32, %c0_i32_0 : i32, i32
  }
  func.func @transform_4(%arg0: i32) -> (i32, i32) {
    %c0_i32 = arith.constant 0 : i32
    %c0_i32_0 = arith.constant 0 : i32
    return %arg0, %c0_i32 : i32, i32
  }
}

</mosaic_0001>

<bundles_post_ra>
// kernel: tpu_custom_call.1
= control target key start
LH: loop header
LB: loop body
LE: loop exit
PB: predicated region body
PF: predicated region fallthrough
CT: control target
= control target key end

     0   :  { %s460_s19 = smov 32   ;;  %s706_s0 = inlined_call_operand.vmem [shape: f32[2,512], index: 0, kind: input, shape index: {}]   ;;  %s707_s1 = inlined_call_operand.vmem [shape: f32[2,32], index: 1, kind: input, shape index: {}]   ;;  %s708_s2 = inlined_call_operand.vmem [shape: f32[2,16], index: 2, kind: input, shape index: {}]   ;;  %s709_s3 = inlined_call_operand.vmem [shape: f32[512,16], index: 3, kind: input, shape index: {}]   ;;  %s710_s4 = inlined_call_operand.hbm [shape: f32[2,16], index: 4, kind: output, shape index: {}]  }
   0x1   :  { %v492_v0 = vld [vmem:[%s707_s1] sm:$0x3]  ;;  %v61_v2 = vld [vmem:[%s709_s3 + $0x88] sm:$0xff]  ;;  %v62_v12 = vld [vmem:[%s709_s3 + $0x90] sm:$0xff] }
   0x2   :  { %v60_v1 = vld [vmem:[%s709_s3 + $0x80] sm:$0xff]  ;;  %21 = vrot.lane.b32.xlu0 %v492_v0, %s460_s19  ;;  %v45_v4 = vld [vmem:[%s709_s3 + $0x8] sm:$0xff]  ;;  %v63_v13 = vld [vmem:[%s709_s3 + $0x98] sm:$0xff] }
   0x3   :  { %v44_v3 = vld [vmem:[%s709_s3] sm:$0xff]  ;;  %v364_v5 = vpack.c.bf16 %v61_v2, %v60_v1  ;;  %v93_v8 = vld [vmem:[%s709_s3 + $0x188] sm:$0xff]  ;;  %v368_v15 = vpack.c.bf16 %v63_v13, %v62_v12  ;;  %v46_v16 = vld [vmem:[%s709_s3 + $0x10] sm:$0xff] }
   0x4   :  { %v366_v6 = vpack.c.bf16 %v45_v4, %v44_v3  ;;  %v92_v7 = vld [vmem:[%s709_s3 + $0x180] sm:$0xff]  ;;  %v77_v11 = vld [vmem:[%s709_s3 + $0x108] sm:$0xff]  ;;  %v47_v17 = vld [vmem:[%s709_s3 + $0x18] sm:$0xff] }
   0x5   :  { %v76_v9 = vld [vmem:[%s709_s3 + $0x100] sm:$0xff]  ;;  %v396_v10 = vpack.c.bf16 %v93_v8, %v92_v7  ;;  %365 = vmatprep.subr.bf16.mxu0 %v364_v5  ;;  %v94_v18 = vld [vmem:[%s709_s3 + $0x190] sm:$0xff]  ;;  %v370_v19 = vpack.c.bf16 %v47_v17, %v46_v16  ;;  %v95_v20 = vld [vmem:[%s709_s3 + $0x198] sm:$0xff] }
   0x6   :  { %v398_v14 = vpack.c.bf16 %v77_v11, %v76_v9  ;;  %367 = vmatpush3.bf16.msra.mxu0 %v366_v6  ;;  %v78_v21 = vld [vmem:[%s709_s3 + $0x110] sm:$0xff]  ;;  %v79_v22 = vld [vmem:[%s709_s3 + $0x118] sm:$0xff]  ;;  %v400_v23 = vpack.c.bf16 %v95_v20, %v94_v18  ;;  %v64_v25 = vld [vmem:[%s709_s3 + $0xa0] sm:$0xff] }
   0x7   :  { %397 = vmatprep.subr.bf16.mxu1 %v396_v10  ;;  %369 = vmatprep.subr.bf16.mxu0 %v368_v15  ;;  %v402_v24 = vpack.c.bf16 %v79_v22, %v78_v21  ;;  %v65_v26 = vld [vmem:[%s709_s3 + $0xa8] sm:$0xff]  ;;  %v48_v27 = vld [vmem:[%s709_s3 + $0x20] sm:$0xff]  ;;  %v66_v35 = vld [vmem:[%s709_s3 + $0xb0] sm:$0xff] }
   0x8   :  { %399 = vmatpush3.bf16.msra.mxu1 %v398_v14  ;;  %v372_v28 = vpack.c.bf16 %v65_v26, %v64_v25  ;;  %v49_v29 = vld [vmem:[%s709_s3 + $0x28] sm:$0xff]  ;;  %v96_v30 = vld [vmem:[%s709_s3 + $0x1a0] sm:$0xff]  ;;  %v67_v37 = vld [vmem:[%s709_s3 + $0xb8] sm:$0xff] }
   0x9   :  { %v97_v31 = vld [vmem:[%s709_s3 + $0x1a8] sm:$0xff]  ;;  %401 = vmatprep.subr.bf16.mxu1 %v400_v23  ;;  %v80_v33 = vld [vmem:[%s709_s3 + $0x120] sm:$0xff]  ;;  %v374_v36 = vpack.c.bf16 %v49_v29, %v48_v27  ;;  %v50_v38 = vld [vmem:[%s709_s3 + $0x30] sm:$0xff]  ;;  %v376_v41 = vpack.c.bf16 %v67_v37, %v66_v35 }
   0xa   :  { %v404_v32 = vpack.c.bf16 %v97_v31, %v96_v30  ;;  %v81_v34 = vld [vmem:[%s709_s3 + $0x128] sm:$0xff]  ;;  %371 = vmatpush3.bf16.msra.mxu0 %v370_v19  ;;  %v51_v39 = vld [vmem:[%s709_s3 + $0x38] sm:$0xff]  ;;  %v98_v42 = vld [vmem:[%s709_s3 + $0x1b0] sm:$0xff] }
   0xb   :  { %373 = vmatprep.subr.bf16.mxu0 %v372_v28  ;;  %v406_v40 = vpack.c.bf16 %v81_v34, %v80_v33  ;;  %v99_v43 = vld [vmem:[%s709_s3 + $0x1b8] sm:$0xff]  ;;  %v82_v44 = vld [vmem:[%s709_s3 + $0x130] sm:$0xff]  ;;  %v68_v47 = vld [vmem:[%s709_s3 + $0xc0] sm:$0xff] }
   0xc   :  { %403 = vmatpush3.bf16.msra.mxu1 %v402_v24  ;;  %v408_v45 = vpack.c.bf16 %v99_v43, %v98_v42  ;;  %v83_v46 = vld [vmem:[%s709_s3 + $0x138] sm:$0xff]  ;;  %v69_v48 = vld [vmem:[%s709_s3 + $0xc8] sm:$0xff] }
   0xd   :  { %405 = vmatprep.subr.bf16.mxu1 %v404_v32 }
   0xe   :  { %9 = vsyncpa [#allocation3], 0  ;;  %375 = vmatpush3.bf16.msra.mxu0 %v374_v36  ;;  %v378_v49 = vpack.c.bf16 %v51_v39, %v50_v38  ;;  %v410_v50 = vpack.c.bf16 %v83_v46, %v82_v44  ;;  %v380_v51 = vpack.c.bf16 %v69_v48, %v68_v47  ;;  %v52_v52 = vld [vmem:[%s709_s3 + $0x40] sm:$0xff]  ;;  %v53_v53 = vld [vmem:[%s709_s3 + $0x48] sm:$0xff]  ;;  %vm24_vm0 = vcmask 261120   ;;  %s461_s11 = smov 64  }
   0xf   :  { %377 = vmatprep.subr.bf16.mxu0 %v376_v41  ;;  %v382_v54 = vpack.c.bf16 %v53_v53, %v52_v52  ;;  %v100_v55 = vld [vmem:[%s709_s3 + $0x1c0] sm:$0xff]  ;;  %v101_v56 = vld [vmem:[%s709_s3 + $0x1c8] sm:$0xff]  ;;  %v70_v61 = vld [vmem:[%s709_s3 + $0xd0] sm:$0xff]  ;;  %v462_v36 = vmov 1983009808   ;;  %v37_v38 = vlaneseq  ;;  %vm30_vm1 = vcmask 523264  }
  0x10   :  { %407 = vmatpush3.bf16.msra.mxu1 %v406_v40  ;;  %v412_v57 = vpack.c.bf16 %v101_v56, %v100_v55  ;;  %v84_v58 = vld [vmem:[%s709_s3 + $0x140] sm:$0xff]  ;;  %v85_v59 = vld [vmem:[%s709_s3 + $0x148] sm:$0xff]  ;;  %v71_v62 = vld [vmem:[%s709_s3 + $0xd8] sm:$0xff]  ;;  %v35_v37 = vunpack.c.l.s4 %v462_v36  ;;  %vm277_vm2 = vcmask 123904  }
  0x11   :  { %409 = vmatprep.subr.bf16.mxu1 %v408_v45  ;;  %v414_v60 = vpack.c.bf16 %v85_v59, %v84_v58  ;;  %v384_v63 = vpack.c.bf16 %v71_v62, %v70_v61  ;;  %v54_v1 = vld [vmem:[%s709_s3 + $0x50] sm:$0xff]  ;;  %v55_v2 = vld [vmem:[%s709_s3 + $0x58] sm:$0xff]  ;;  %v72_v10 = vld [vmem:[%s709_s3 + $0xe0] sm:$0xff]  ;;  %v38_v40 = vshrl.u32 %v37_v38, 7 }
  0x12   :  { %379 = vmatpush3.bf16.msra.mxu0 %v378_v49  ;;  %v386_v3 = vpack.c.bf16 %v55_v2, %v54_v1  ;;  %v102_v4 = vld [vmem:[%s709_s3 + $0x1d0] sm:$0xff]  ;;  %v103_v5 = vld [vmem:[%s709_s3 + $0x1d8] sm:$0xff]  ;;  %v73_v11 = vld [vmem:[%s709_s3 + $0xe8] sm:$0xff]  ;;  %v36_v39 = vunpack.c.0.s8 %v35_v37 }
  0x13   :  { %381 = vmatprep.subr.bf16.mxu0 %v380_v51  ;;  %v416_v6 = vpack.c.bf16 %v103_v5, %v102_v4  ;;  %v86_v7 = vld [vmem:[%s709_s3 + $0x150] sm:$0xff]  ;;  %v87_v8 = vld [vmem:[%s709_s3 + $0x158] sm:$0xff]  ;;  %v388_v12 = vpack.c.bf16 %v73_v11, %v72_v10  ;;  %v56_v13 = vld [vmem:[%s709_s3 + $0x60] sm:$0xff] }
  0x14   :  { %411 = vmatpush3.bf16.msra.mxu1 %v410_v50  ;;  %v418_v9 = vpack.c.bf16 %v87_v8, %v86_v7  ;;  %v57_v14 = vld [vmem:[%s709_s3 + $0x68] sm:$0xff]  ;;  %v104_v16 = vld [vmem:[%s709_s3 + $0x1e0] sm:$0xff]  ;;  %v74_v21 = vld [vmem:[%s709_s3 + $0xf0] sm:$0xff]  ;;  %v39_v41 = vsub.s32 %v36_v39, %v38_v40 }
  0x15   :  { %413 = vmatprep.subr.bf16.mxu1 %v412_v57  ;;  %v390_v15 = vpack.c.bf16 %v57_v14, %v56_v13  ;;  %v105_v17 = vld [vmem:[%s709_s3 + $0x1e8] sm:$0xff]  ;;  %v88_v18 = vld [vmem:[%s709_s3 + $0x160] sm:$0xff]  ;;  %v75_v22 = vld [vmem:[%s709_s3 + $0xf8] sm:$0xff] }
  0x16   :  { %383 = vmatpush3.bf16.msra.mxu0 %v382_v54  ;;  %v420_v19 = vpack.c.bf16 %v105_v17, %v104_v16  ;;  %v89_v20 = vld [vmem:[%s709_s3 + $0x168] sm:$0xff]  ;;  %v392_v24 = vpack.c.bf16 %v75_v22, %v74_v21  ;;  %v58_v25 = vld [vmem:[%s709_s3 + $0x70] sm:$0xff]  ;;  %v59_v26 = vld [vmem:[%s709_s3 + $0x78] sm:$0xff] }
  0x17   :  { %385 = vmatprep.subr.bf16.mxu0 %v384_v63  ;;  %v422_v23 = vpack.c.bf16 %v89_v20, %v88_v18  ;;  %v106_v27 = vld [vmem:[%s709_s3 + $0x1f0] sm:$0xff]  ;;  %v394_v28 = vpack.c.bf16 %v59_v26, %v58_v25  ;;  %v107_v29 = vld [vmem:[%s709_s3 + $0x1f8] sm:$0xff]  ;;  %v18_v46 = vld [vmem:[%s706_s0] sm:$0xff]  ;;  %s463_s0 = smov [#allocation2]  }
  0x18   :  { %415 = vmatpush3.bf16.msra.mxu1 %v414_v60  ;;  %v424_v30 = vpack.c.bf16 %v107_v29, %v106_v27  ;;  %v90_v31 = vld [vmem:[%s709_s3 + $0x170] sm:$0xff]  ;;  %v91_v32 = vld [vmem:[%s709_s3 + $0x178] sm:$0xff]  ;;  %v108_v54 = vld [vmem:[%s708_s2] sm:$0x3]  ;;  %s285_s15 = sshll.u32 %s463_s0, 4  ;;  %s286_s15 = int_to_ptr.vmem [resolvable:$true] %s285_s15 }
  0x19   :  { %417 = vmatprep.subr.bf16.mxu1 %v416_v6  ;;  %v426_v34 = vpack.c.bf16 %v91_v32, %v90_v31  ;;  %s436_s16 = scalar_lea.vmem %s286_s15, 32  ;;  %p441_p1 = scmp.lt.s32.totalorder %s286_s15, %s286_s15 }
  0x1a   :  { %387 = vmatpush3.bf16.msra.mxu0 %v386_v3  ;;  %p437_p0 = scmp.ne.s32.totalorder %s286_s15, %s436_s16  ;;  %p442_p2 = scmp.lt.s32.totalorder %s436_s16, %s436_s16 }
  0x1b   :  { %389 = vmatprep.subr.bf16.mxu0 %v388_v12 }
  0x1c   :  { %419 = vmatpush3.bf16.msra.mxu1 %v418_v9  ;;  %p443_p3 = por %p442_p2, %p441_p1 }
  0x1d   :  { %421 = vmatprep.subr.bf16.mxu1 %v420_v19 }
  0x1e   :  { %391 = vmatpush3.bf16.msra.mxu0 %v390_v15  ;;  %p444_p4 = pnand %p443_p3, %p437_p0 }
  0x1f   :  { %393 = vmatprep.subr.bf16.mxu0 %v392_v24 }
  0x20   :  { %423 = vmatpush3.bf16.msra.mxu1 %v422_v23 }
  0x21   :  { %425 = vmatprep.subr.bf16.mxu1 %v424_v30 }
  0x22   :  { %395 = vmatpush3.bf16.msra.mxu0 %v394_v28 }
  0x24   :  { %427 = vmatpush3.bf16.msra.mxu1 %v426_v34 }
  0x74   :  { %v22_v33 = vpop.permute.xlu0 %21 }
  0x75   :  { %v25_v35 = vsel %vm24_vm0, %v492_v0, %v22_v33 }
  0x76   :  { %27 = vrot.lane.b32.xlu0 %v25_v35, %s461_s11 }
  0xe8   :  { %v28_v42 = vpop.permute.xlu0 %27 }
  0xe9   :  { %v31_v43 = vsel %vm30_vm1, %v25_v35, %v28_v42 }
  0xea   :  { %v33_v44 = vcombine.low %v31_v43, %v31_v43 }
  0xec   :  { %v40_v45 = vrot.slane %v33_v44, %v39_v41 }
  0xee   :  { %v41_v47 = vcombine.low %v40_v45, %v40_v45 }
  0xf0   :  { %v43_v0 = vmul.f32 %v41_v47, %v18_v46 }
  0xf2   :  { %v117_v48 = vrot.slane %v43_v0, %v39_v41  ;;  %v110_v49 = vcombine.high %v43_v0, %v43_v0 }
  0xf4   :  { %v125_v50 = vcombine.high %v117_v48, %v117_v48  ;;  %v124_v51 = vrot.slane %v110_v49, %v39_v41 }
  0xf6   :  { %195 = vmatprep.mubr.f32.mxu0 %v125_v50  ;;  %v126_v52 = vcombine.high %v124_v51, %v124_v51 }
  0xf7   :  { %196 = vmatmul.mubr.f32.vlgmr.msra.gmra.mrb[0].mxu0 %v117_v48 }
  0xf8   :  { %265 = vmatprep.mubr.f32.mxu1 %v126_v52 }
  0xf9   :  { %266 = vmatmul.mubr.f32.vlgmr.msra.gmra.mrb[0].mxu1 %v124_v51 }
 0x1ca   :  { %v326_v53 = vpop.f32.mrb[0].mxu0 }
 0x1cb   :  { %v327_v55 = vpop.f32.mrb[1].mxu0 }
 0x1cc   :  { %v328_v56 = vadd.f32 %v327_v55, %v326_v53  ;;  %v361_v57 = vpop.f32.mrb[0].mxu1 }
 0x1cd   :  { %v362_v58 = vpop.f32.mrb[1].mxu1 }
 0x1ce   :  { %v198_v59 = vadd.f32 %v328_v56, %v108_v54  ;;  %v363_v60 = vadd.f32 %v362_v58, %v361_v57 }
 0x1d0   :  { %v268_v61 = vadd.f32 %v363_v60, %v198_v59 }
 0x1d2   :  { %v293_v62 = vmul.f32 -1.442695, %v268_v61 }
 0x1d4   :  { %432 = vpow2.f32 %v293_v62 }
 0x1de   :  { %v433_v63 = vpop.eup %432 }
 0x1df   :  { %v274_v1 = vadd.f32 1.0, %v433_v63 }
 0x1e1   :  { %434 = vrcp.f32 %v274_v1 }
 0x1eb   :  { %v435_v2 = vpop.eup %434 }
 0x1ec   :  { %278 = vst.msk [vmem:[#allocation2] sm:$0x3] %vm277_vm2, %v435_v2 }
 0x1ed   :  { %447 = shalt.err (!%p444_p4)
}
 0x1ee   :  { %s448_s18 = scalar_lea.hbm %s710_s4, 32 }
 0x1ef   :  { %p449_p5 = scmp.ne.s32.totalorder %s710_s4, %s448_s18  ;;  %p452_p6 = scmp.lt.u32.totalorder %s448_s18, %s710_s4 }
 0x1f1   :  { %p454_p7 = pnand %p452_p6, %p449_p5 }
 0x1f3   :  { %457 = shalt.err (!%p454_p7)
}
 0x1f4   :  { %288 = dma.vmem_to_hbm [thread:$0]  %s286_s15, 32, %s710_s4, [#allocation3]  }
 0x1f5   :  { %458 = dma.done.wait [#allocation3], 32  }
 0x1f6   :  { %459 = vsyncadd [#allocation3], 4294967264 }
 0x1f7   :  { %292 = vsyncpa [#allocation3], 1 }

</bundles_post_ra>
